<compile_context>
chip_gen: v7x
topology: tpu7x:2x2x1
jax: 0.10.0
libtpu: 0.0.40
codegen_flags: <defaults>
</compile_context>

<pallas_src>
import functools

import jax
import jax.numpy as jnp
from jax.experimental import pallas as pl
from jax.experimental.pallas import tpu as pltpu


# ----------------------------- kernels ------------------------------------


def _tversky_packed_kernel(o_ref, t_ref, out_ref, pg_sc, so_sc, st_sc, *,
                           ignore_index, n_rows, rows_per_tile,
                           chunks_per_split, first_ragged_chunk, needs_mask):
    """Lane-packed reduction path.

    Inputs are viewed as (N, n_rows, 128); blocks are (1, rows_per_tile, 128)
    on a (N, n_splits, chunks_per_split) grid.  pg/so/st scratch hold (8, 128)
    sublane+lane partials of Sum(o*t), Sum(o), Sum(t).  At the last chunk of
    each (batch, split) the three partial planes are dumped to the output;
    the Tversky finalize (a handful of scalar ops per sample) happens in the
    wrapper.
    """
    s = pl.program_id(1)
    j = pl.program_id(2)

    @pl.when(j == 0)
    def _():
        pg_sc[...] = jnp.zeros_like(pg_sc)
        so_sc[...] = jnp.zeros_like(so_sc)
        st_sc[...] = jnp.zeros_like(st_sc)

    o = o_ref[...].astype(jnp.float32)            # (1, rows_per_tile, 128)
    t = t_ref[...].astype(jnp.float32)

    if ignore_index is not None:
        valid = (t != ignore_index).astype(jnp.float32)
        o = o * valid
        t = t * valid

    groups = rows_per_tile // 8

    def _accumulate(oo, tt):
        # (1, R, 128) -> (R//8, 8, 128): sublane-split reshape aligned to the
        # (8, 128) tiling; the group-axis sum is pure vreg adds (no XLU).
        o3 = oo.reshape(groups, 8, 128)
        t3 = tt.reshape(groups, 8, 128)
        pg_sc[...] += jnp.sum(o3 * t3, axis=0)
        so_sc[...] += jnp.sum(o3, axis=0)
        st_sc[...] += jnp.sum(t3, axis=0)

    if needs_mask:
        gj = s * chunks_per_split + j             # global (unclamped) chunk id

        @pl.when(gj < first_ragged_chunk)
        def _():
            _accumulate(o, t)

        @pl.when(gj >= first_ragged_chunk)
        def _():
            row = jax.lax.broadcasted_iota(jnp.int32, (1, rows_per_tile, 1), 1)
            keep = (row + gj * rows_per_tile) < n_rows
            _accumulate(jnp.where(keep, o, 0.0), jnp.where(keep, t, 0.0))
    else:
        _accumulate(o, t)

    @pl.when(j == pl.num_programs(2) - 1)
    def _():
        out_ref[0, 0, 0:8, :] = pg_sc[...]
        out_ref[0, 0, 8:16, :] = so_sc[...]
        out_ref[0, 0, 16:24, :] = st_sc[...]


def _tversky_flat_kernel(o_ref, t_ref, loss_ref, pg_sc, so_sc, st_sc, *,
                         alpha, beta, epsilon, ignore_index,
                         d, tile_d, needs_mask):
    """Fallback path (D not lane-packable, or fewer than one sublane pack of
    128-lane rows per sample).

    Inputs are (N, D); blocks are (tile_n, tile_d) on a
    (batch_tiles, d_chunks) grid.  Accumulators are per-sample (tile_n, 1).
    """
    j = pl.program_id(1)

    @pl.when(j == 0)
    def _():
        pg_sc[...] = jnp.zeros_like(pg_sc)
        so_sc[...] = jnp.zeros_like(so_sc)
        st_sc[...] = jnp.zeros_like(st_sc)

    o = o_ref[...].astype(jnp.float32)            # (tile_n, tile_d)
    t = t_ref[...].astype(jnp.float32)

    if ignore_index is not None:
        valid = (t != ignore_index).astype(jnp.float32)
        o = o * valid
        t = t * valid

    def _accumulate(oo, tt):
        pg_sc[...] += jnp.sum(oo * tt, axis=1, keepdims=True)
        so_sc[...] += jnp.sum(oo, axis=1, keepdims=True)
        st_sc[...] += jnp.sum(tt, axis=1, keepdims=True)

    last = pl.num_programs(1) - 1
    if needs_mask:
        @pl.when(j < last)
        def _():
            _accumulate(o, t)

        @pl.when(j == last)
        def _():
            col = jax.lax.broadcasted_iota(jnp.int32, (1, tile_d), 1)
            keep = (col + j * tile_d) < d
            _accumulate(jnp.where(keep, o, 0.0), jnp.where(keep, t, 0.0))
    else:
        _accumulate(o, t)

    @pl.when(j == last)
    def _():
        pg = pg_sc[...]
        p_ng = so_sc[...] - pg
        np_g = st_sc[...] - pg
        ti = pg / (pg + alpha * p_ng + beta * np_g + epsilon)
        loss_ref[...] = 1.0 - ti


# ----------------------------- wrapper -------------------------------------


def _device_block_bytes():
    """Per-generation per-input block-byte target (HBM-bandwidth-bound)."""
    kind = ""
    try:
        kind = jax.devices()[0].device_kind.lower()
    except Exception:
        pass
    if "v5 lite" in kind or "v5e" in kind or "v5litepod" in kind:
        return 3 << 20          # v5e: 16 MiB scoped default, 0.82 TB/s HBM
    if "v6" in kind:
        return 6 << 20          # v6e: 1.3-1.4 TB/s HBM, 128 MiB VMEM
    if "v7" in kind:
        return 6 << 20          # v7x: 3.2 TB/s HBM but only 64 MiB VMEM
    return 4 << 20


def _reduce(loss, reduction):
    if reduction == 'none':
        return loss
    elif reduction == 'sum':
        return jnp.sum(loss)
    elif reduction == 'mean':
        return jnp.mean(loss)
    else:
        raise Exception('Unexpected reduction {}'.format(reduction))


def binary_tversky_loss_v2(output, target, *, alpha=0.5, beta=0.5,
                           ignore_index=None, reduction='mean',
                           target_block_bytes=None):
    """JAX/Pallas equivalent of BinaryTverskyLossV2.forward.

    output, target: arrays of shape [N, 1, (d,), h, w] (any [N, ...]).
    Returns a scalar (mean/sum) or a per-batch vector (none), float32.
    """
    if output.shape != target.shape:
        raise ValueError("output/target shape mismatch")

    # __init__ normalization: the module's `if sum != 1:` is always truthy,
    # so alpha/beta are always divided by their sum.
    ab = float(alpha) + float(beta)
    alpha_n = float(alpha) / ab
    beta_n = float(beta) / ab
    epsilon = 1e-08
    ignore_index = None if ignore_index is None else float(ignore_index)

    n = int(output.shape[0])
    d = 1
    for dim in output.shape[1:]:
        d *= int(dim)

    if d == 0:
        # Degenerate spatial dims: P_G = P_NG = NP_G = 0 -> TI = 0 -> loss = 1.
        return _reduce(jnp.ones((n,), jnp.float32), reduction)

    itemsize = max(jnp.dtype(output.dtype).itemsize,
                   jnp.dtype(target.dtype).itemsize)
    pack = max(8, 32 // itemsize)        # sublane pack: 8 f32 / 16 bf16 / 32 i8

    # ---- per-generation block sizing + explicit VMEM budget -----------------
    block_bytes = int(target_block_bytes) if target_block_bytes else \
        _device_block_bytes()
    upcast = max(1, 4 // itemsize)
    vmem_cap = 56 << 20                  # below v7x's 64 MiB physical VMEM

    def _vmem_needed(bb):
        # 2 inputs x double-buffered blocks + ~4 block-sized f32 temporaries
        # (upcast / ignore-mask / product) + slack for scratch & internals.
        return 4 * bb + 4 * bb * upcast + (2 << 20)

    while _vmem_needed(block_bytes) > vmem_cap and block_bytes > (256 << 10):
        block_bytes //= 2
    vmem_limit = int(min(vmem_cap, max(32 << 20, _vmem_needed(block_bytes))))

    n_rows = d // 128 if d % 128 == 0 else 0

    if d % 128 == 0 and n_rows >= pack:
        # --------------------- packed (lane-dense) path ----------------------
        rows_budget = max(pack, (block_bytes // (128 * itemsize)) // pack * pack)
        if n_rows <= rows_budget:
            rows_per_tile = (n_rows // pack) * pack      # >= pack
        else:
            rows_per_tile = rows_budget
        n_chunks = pl.cdiv(n_rows, rows_per_tile)

        # Give v7x's second TensorCore work when the batch axis is too small
        # to parallelize by itself.  Harmless on 1-TC chips: the split just
        # becomes another sequential slice of the same reduction.
        n_splits = 2 if (n < 4 and n_chunks >= 4) else 1
        cps = pl.cdiv(n_chunks, n_splits)
        first_ragged = n_rows // rows_per_tile
        needs_mask = (n_splits * cps * rows_per_tile) != n_rows

        o3 = output.reshape(n, n_rows, 128)    # free reshape (no pad / astype)
        t3 = target.reshape(n, n_rows, 128)

        kernel = functools.partial(
            _tversky_packed_kernel, ignore_index=ignore_index, n_rows=n_rows,
            rows_per_tile=rows_per_tile, chunks_per_split=cps,
            first_ragged_chunk=first_ragged, needs_mask=needs_mask)

        def in_map(b, sp, j):
            # Clamp so the DMA window never goes fully out of bounds when the
            # chunk count does not divide evenly between splits; the in-kernel
            # mask (built from the *unclamped* index) zeroes duplicated rows.
            return (b, jnp.minimum(sp * cps + j, n_chunks - 1), 0)

        # NOTE: if an xprof trace on v7x ever shows exposed DMA between steps,
        # add pipeline_mode=pl.Buffered(3) to the two input BlockSpecs.
        partial_sums = pl.pallas_call(
            kernel,
            out_shape=jax.ShapeDtypeStruct((n, n_splits, 24, 128), jnp.float32),
            grid_spec=pltpu.PrefetchScalarGridSpec(
                num_scalar_prefetch=0,
                grid=(n, n_splits, cps),
                in_specs=[
                    pl.BlockSpec((1, rows_per_tile, 128), in_map),
                    pl.BlockSpec((1, rows_per_tile, 128), in_map),
                ],
                out_specs=pl.BlockSpec((1, 1, 24, 128),
                                       lambda b, sp, j: (b, sp, 0, 0)),
                scratch_shapes=[pltpu.VMEM((8, 128), jnp.float32)] * 3,
            ),
            compiler_params=pltpu.CompilerParams(
                dimension_semantics=("parallel", "parallel", "arbitrary"),
                vmem_limit_bytes=vmem_limit),
            cost_estimate=pl.CostEstimate(
                flops=5 * n * d, transcendentals=0,
                bytes_accessed=2 * n * d * itemsize
                + n * n_splits * 24 * 128 * 4),
        )(o3, t3)

        # Tiny finalize: combine splits / sublanes / lanes, then Tversky.
        sums = partial_sums.reshape(n, n_splits, 3, 8, 128).sum(axis=(1, 3, 4))
        pg, so, st = sums[:, 0], sums[:, 1], sums[:, 2]
        p_ng = so - pg                     # Sum(o*(1-t)) = Sum(o) - Sum(o*t)
        np_g = st - pg                     # Sum((1-o)*t) = Sum(t) - Sum(o*t)
        ti = pg / (pg + alpha_n * p_ng + beta_n * np_g + epsilon)
        loss = 1.0 - ti
    else:
        # ------------------ flat fallback: 2-D (N, D) tiling -----------------
        o2 = output.reshape(n, d)
        t2 = target.reshape(n, d)

        row_bytes = d * itemsize
        if row_bytes <= block_bytes:
            # Whole sample rows fit: pack multiple samples per block
            # (large-N / small-D case), batch axis is the parallel axis.
            tile_d = d
            d_chunks = 1
            needs_mask = False
            tn = max(pack, (block_bytes // row_bytes) // pack * pack)
            tn = min(tn, 2048)             # keep (tile_n, 1) accumulators small
            tile_n = n if tn >= n else tn
        else:
            tile_n = n if n <= pack else pack
            tile_d = max(128, (block_bytes // (tile_n * itemsize)) // 128 * 128)
            if tile_d >= d:
                tile_d = d
                d_chunks = 1
                needs_mask = False
            else:
                d_chunks = pl.cdiv(d, tile_d)
                needs_mask = (d % tile_d) != 0
        n_btiles = pl.cdiv(n, tile_n)

        kernel = functools.partial(
            _tversky_flat_kernel, alpha=alpha_n, beta=beta_n, epsilon=epsilon,
            ignore_index=ignore_index, d=d, tile_d=tile_d,
            needs_mask=needs_mask)

        out = pl.pallas_call(
            kernel,
            out_shape=jax.ShapeDtypeStruct((n, 1), jnp.float32),
            grid_spec=pltpu.PrefetchScalarGridSpec(
                num_scalar_prefetch=0,
                grid=(n_btiles, d_chunks),
                in_specs=[
                    pl.BlockSpec((tile_n, tile_d), lambda b, j: (b, j)),
                    pl.BlockSpec((tile_n, tile_d), lambda b, j: (b, j)),
                ],
                out_specs=pl.BlockSpec((tile_n, 1), lambda b, j: (b, 0)),
                scratch_shapes=[pltpu.VMEM((tile_n, 1), jnp.float32)] * 3,
            ),
            compiler_params=pltpu.CompilerParams(
                dimension_semantics=("parallel", "arbitrary"),
                vmem_limit_bytes=vmem_limit),
            cost_estimate=pl.CostEstimate(
                flops=5 * n * d, transcendentals=0,
                bytes_accessed=2 * n * d * itemsize + n * 4),
        )(o2, t2)
        loss = out[:, 0]

    return _reduce(loss, reduction)


# ----------------------------- reference & test -----------------------------


def _reference(output, target, alpha=0.5, beta=0.5, ignore_index=None,
               reduction='mean'):
    s = alpha + beta
    alpha, beta = alpha / s, beta / s
    n = output.shape[0]
    o = output.astype(jnp.float32)
    t = target.astype(jnp.float32)
    if ignore_index is not None:
        valid = (t != ignore_index).astype(jnp.float32)
        o = o * valid
        t = t * valid
    o = o.reshape(n, -1)
    t = t.reshape(n, -1)
    pg = jnp.sum(o * t, 1)
    png = jnp.sum(o * (1 - t), 1)
    npg = jnp.sum((1 - o) * t, 1)
    ti = pg / (pg + alpha * png + beta * npg + 1e-08)
    loss = 1.0 - ti
    if reduction == 'none':
        return loss
    if reduction == 'sum':
        return jnp.sum(loss)
    return jnp.mean(loss)


if __name__ == "__main__":
    keys = jax.random.split(jax.random.PRNGKey(0), 12)

    # 1) Small-D case ([2,1,16,16], D=256): flat path, whole sample per block,
    #    defaults, 'mean'.
    out1 = jax.random.normal(keys[0], (2, 1, 16, 16), dtype=jnp.float32)
    tgt1 = (jax.random.uniform(keys[1], (2, 1, 16, 16)) > 0.5).astype(jnp.float32)
    loss1 = jax.block_until_ready(binary_tversky_loss_v2(out1, tgt1))
    ref1 = _reference(out1, tgt1)
    assert jnp.allclose(loss1, ref1, rtol=1e-5, atol=1e-5), (loss1, ref1)

    # 2) Packed path, N=1 -> reduction split across cores (odd chunk count ->
    #    clamped overflow chunk + ragged last real chunk), tiny block budget
    #    to force chunking at this small shape. 'none'.
    out2 = jax.random.normal(keys[2], (1, 1, 33, 128), dtype=jnp.float32)
    tgt2 = (jax.random.uniform(keys[3], (1, 1, 33, 128)) > 0.5).astype(jnp.float32)
    loss2 = jax.block_until_ready(
        binary_tversky_loss_v2(out2, tgt2, reduction='none',
                               target_block_bytes=8 * 128 * 4))
    ref2 = _reference(out2, tgt2, reduction='none')
    assert jnp.allclose(loss2, ref2, rtol=1e-5, atol=1e-5), (loss2, ref2)

    # 3) Flat path, D=320 (not a multiple of 128) with lane-ragged chunks,
    #    ignore_index, non-default alpha/beta (exercises normalization), 'sum'.
    out3 = jax.random.normal(keys[4], (2, 1, 16, 20), dtype=jnp.float32)
    base = (jax.random.uniform(keys[5], (2, 1, 16, 20)) > 0.5).astype(jnp.float32)
    tgt3 = jnp.where(jax.random.uniform(keys[6], (2, 1, 16, 20)) > 0.85,
                     255.0, base)
    loss3 = jax.block_until_ready(
        binary_tversky_loss_v2(out3, tgt3, alpha=1.0, beta=3.0,
                               ignore_index=255, reduction='sum',
                               target_block_bytes=2 * 128 * 4))
    ref3 = _reference(out3, tgt3, alpha=1.0, beta=3.0, ignore_index=255,
                      reduction='sum')
    assert jnp.allclose(loss3, ref3, rtol=1e-5, atol=1e-5), (loss3, ref3)

    # 4) Packed path with bf16 inputs (sublane pack 16), single chunk, 'mean'.
    out4 = jax.random.normal(keys[7], (2, 1, 32, 128), dtype=jnp.bfloat16)
    tgt4 = (jax.random.uniform(keys[8], (2, 1, 32, 128)) > 0.5).astype(jnp.bfloat16)
    loss4 = jax.block_until_ready(binary_tversky_loss_v2(out4, tgt4))
    ref4 = _reference(out4, tgt4)
    assert jnp.allclose(loss4, ref4, rtol=1e-4, atol=1e-4), (loss4, ref4)

    # 5) Flat path, large-ish N / tiny D with batch tiling and a ragged last
    #    batch tile (20 samples, tile_n=8). 'none'.
    out5 = jax.random.normal(keys[9], (20, 1, 8, 16), dtype=jnp.float32)
    tgt5 = (jax.random.uniform(keys[10], (20, 1, 8, 16)) > 0.5).astype(jnp.float32)
    loss5 = jax.block_until_ready(
        binary_tversky_loss_v2(out5, tgt5, reduction='none',
                               target_block_bytes=8 * 128 * 4))
    ref5 = _reference(out5, tgt5, reduction='none')
    assert jnp.allclose(loss5, ref5, rtol=1e-5, atol=1e-5), (loss5, ref5)

    print("KERNEL_OK")
</pallas_src>

<mosaic_0001>
module attributes {stable_mosaic.version = 11 : i64} {
  func.func @_tversky_flat_kernel(%arg0: i32, %arg1: i32, %arg2: memref<2x256xf32, #tpu.memory_space<vmem>>, %arg3: memref<2x256xf32, #tpu.memory_space<vmem>>, %arg4: memref<2x1xf32, #tpu.memory_space<vmem>>, %arg5: memref<2x1xf32, #tpu.memory_space<vmem>>, %arg6: memref<2x1xf32, #tpu.memory_space<vmem>>, %arg7: memref<2x1xf32, #tpu.memory_space<vmem>>) attributes {dimension_semantics = [#tpu.dimension_semantics<parallel>, #tpu.dimension_semantics<arbitrary>], iteration_bounds = array<i64: 1, 1>, scalar_prefetch = 0 : i64, scratch_operands = 3 : i64, tpu.core_type = #tpu.core_type<tc>, window_params = [{transform_indices = @transform_0, window_bounds = array<i64: 2, 256>}, {transform_indices = @transform_1, window_bounds = array<i64: 2, 256>}, {transform_indices = @transform_2, window_bounds = array<i64: 2, 1>}]} {
    %c0_i32 = arith.constant 0 : i32
    %0 = arith.cmpi eq, %arg1, %c0_i32 : i32
    %1 = arith.extui %0 : i1 to i32
    %c0_i32_0 = arith.constant 0 : i32
    %2 = arith.cmpi ne, %1, %c0_i32_0 : i32
    scf.if %2 {
      %cst_20 = arith.constant 0.000000e+00 : f32
      %24 = vector.broadcast %cst_20 : f32 to vector<2x1xf32>
      %c0_21 = arith.constant 0 : index
      %c0_22 = arith.constant 0 : index
      %25 = vector.load %arg5[%c0_21, %c0_22] : memref<2x1xf32, #tpu.memory_space<vmem>>, vector<2x1xf32>
      tpu.vector_store %arg5[%c0_21, %c0_22], %24 {strides = array<i32>} : memref<2x1xf32, #tpu.memory_space<vmem>>, vector<2x1xf32>,
      %cst_23 = arith.constant 0.000000e+00 : f32
      %26 = vector.broadcast %cst_23 : f32 to vector<2x1xf32>
      %c0_24 = arith.constant 0 : index
      %c0_25 = arith.constant 0 : index
      %27 = vector.load %arg6[%c0_24, %c0_25] : memref<2x1xf32, #tpu.memory_space<vmem>>, vector<2x1xf32>
      tpu.vector_store %arg6[%c0_24, %c0_25], %26 {strides = array<i32>} : memref<2x1xf32, #tpu.memory_space<vmem>>, vector<2x1xf32>,
      %cst_26 = arith.constant 0.000000e+00 : f32
      %28 = vector.broadcast %cst_26 : f32 to vector<2x1xf32>
      %c0_27 = arith.constant 0 : index
      %c0_28 = arith.constant 0 : index
      %29 = vector.load %arg7[%c0_27, %c0_28] : memref<2x1xf32, #tpu.memory_space<vmem>>, vector<2x1xf32>
      tpu.vector_store %arg7[%c0_27, %c0_28], %28 {strides = array<i32>} : memref<2x1xf32, #tpu.memory_space<vmem>>, vector<2x1xf32>,
    } else {
    }
    %c0 = arith.constant 0 : index
    %c0_1 = arith.constant 0 : index
    %3 = vector.load %arg2[%c0, %c0_1] : memref<2x256xf32, #tpu.memory_space<vmem>>, vector<2x256xf32>
    %c0_2 = arith.constant 0 : index
    %c0_3 = arith.constant 0 : index
    %4 = vector.load %arg3[%c0_2, %c0_3] : memref<2x256xf32, #tpu.memory_space<vmem>>, vector<2x256xf32>
    %c0_4 = arith.constant 0 : index
    %c0_5 = arith.constant 0 : index
    %5 = vector.load %arg5[%c0_4, %c0_5] : memref<2x1xf32, #tpu.memory_space<vmem>>, vector<2x1xf32>
    %6 = arith.mulf %3, %4 : vector<2x256xf32>
    %cst = arith.constant dense<0.000000e+00> : vector<2xf32>
    %7 = vector.multi_reduction <add>, %6, %cst [1] : vector<2x256xf32> to vector<2xf32>
    %8 = vector.shape_cast %7 : vector<2xf32> to vector<2x1xf32>
    %9 = arith.addf %5, %8 : vector<2x1xf32>
    %c0_6 = arith.constant 0 : index
    %c0_7 = arith.constant 0 : index
    %10 = vector.load %arg5[%c0_6, %c0_7] : memref<2x1xf32, #tpu.memory_space<vmem>>, vector<2x1xf32>
    tpu.vector_store %arg5[%c0_6, %c0_7], %9 {strides = array<i32>} : memref<2x1xf32, #tpu.memory_space<vmem>>, vector<2x1xf32>,
    %c0_8 = arith.constant 0 : index
    %c0_9 = arith.constant 0 : index
    %11 = vector.load %arg6[%c0_8, %c0_9] : memref<2x1xf32, #tpu.memory_space<vmem>>, vector<2x1xf32>
    %cst_10 = arith.constant dense<0.000000e+00> : vector<2xf32>
    %12 = vector.multi_reduction <add>, %3, %cst_10 [1] : vector<2x256xf32> to vector<2xf32>
    %13 = vector.shape_cast %12 : vector<2xf32> to vector<2x1xf32>
    %14 = arith.addf %11, %13 : vector<2x1xf32>
    %c0_11 = arith.constant 0 : index
    %c0_12 = arith.constant 0 : index
    %15 = vector.load %arg6[%c0_11, %c0_12] : memref<2x1xf32, #tpu.memory_space<vmem>>, vector<2x1xf32>
    tpu.vector_store %arg6[%c0_11, %c0_12], %14 {strides = array<i32>} : memref<2x1xf32, #tpu.memory_space<vmem>>, vector<2x1xf32>,
    %c0_13 = arith.constant 0 : index
    %c0_14 = arith.constant 0 : index
    %16 = vector.load %arg7[%c0_13, %c0_14] : memref<2x1xf32, #tpu.memory_space<vmem>>, vector<2x1xf32>
    %cst_15 = arith.constant dense<0.000000e+00> : vector<2xf32>
    %17 = vector.multi_reduction <add>, %4, %cst_15 [1] : vector<2x256xf32> to vector<2xf32>
    %18 = vector.shape_cast %17 : vector<2xf32> to vector<2x1xf32>
    %19 = arith.addf %16, %18 : vector<2x1xf32>
    %c0_16 = arith.constant 0 : index
    %c0_17 = arith.constant 0 : index
    %20 = vector.load %arg7[%c0_16, %c0_17] : memref<2x1xf32, #tpu.memory_space<vmem>>, vector<2x1xf32>
    tpu.vector_store %arg7[%c0_16, %c0_17], %19 {strides = array<i32>} : memref<2x1xf32, #tpu.memory_space<vmem>>, vector<2x1xf32>,
    %c0_i32_18 = arith.constant 0 : i32
    %21 = arith.cmpi eq, %arg1, %c0_i32_18 : i32
    %22 = arith.extui %21 : i1 to i32
    %c0_i32_19 = arith.constant 0 : i32
    %23 = arith.cmpi ne, %22, %c0_i32_19 : i32
    scf.if %23 {
      %c0_20 = arith.constant 0 : index
      %c0_21 = arith.constant 0 : index
      %24 = vector.load %arg5[%c0_20, %c0_21] : memref<2x1xf32, #tpu.memory_space<vmem>>, vector<2x1xf32>
      %c0_22 = arith.constant 0 : index
      %c0_23 = arith.constant 0 : index
      %25 = vector.load %arg6[%c0_22, %c0_23] : memref<2x1xf32, #tpu.memory_space<vmem>>, vector<2x1xf32>
      %26 = arith.subf %25, %24 : vector<2x1xf32>
      %c0_24 = arith.constant 0 : index
      %c0_25 = arith.constant 0 : index
      %27 = vector.load %arg7[%c0_24, %c0_25] : memref<2x1xf32, #tpu.memory_space<vmem>>, vector<2x1xf32>
      %28 = arith.subf %27, %24 : vector<2x1xf32>
      %cst_26 = arith.constant 5.000000e-01 : f32
      %29 = vector.broadcast %cst_26 : f32 to vector<2x1xf32>
      %30 = arith.mulf %29, %26 : vector<2x1xf32>
      %31 = arith.addf %24, %30 : vector<2x1xf32>
      %cst_27 = arith.constant 5.000000e-01 : f32
      %32 = vector.broadcast %cst_27 : f32 to vector<2x1xf32>
      %33 = arith.mulf %32, %28 : vector<2x1xf32>
      %34 = arith.addf %31, %33 : vector<2x1xf32>
      %cst_28 = arith.constant 9.99999993E-9 : f32
      %35 = vector.broadcast %cst_28 : f32 to vector<2x1xf32>
      %36 = arith.addf %34, %35 : vector<2x1xf32>
      %37 = arith.divf %24, %36 : vector<2x1xf32>
      %cst_29 = arith.constant 1.000000e+00 : f32
      %38 = vector.broadcast %cst_29 : f32 to vector<2x1xf32>
      %39 = arith.subf %38, %37 : vector<2x1xf32>
      %c0_30 = arith.constant 0 : index
      %c0_31 = arith.constant 0 : index
      %40 = vector.load %arg4[%c0_30, %c0_31] : memref<2x1xf32, #tpu.memory_space<vmem>>, vector<2x1xf32>
      tpu.vector_store %arg4[%c0_30, %c0_31], %39 {strides = array<i32>} : memref<2x1xf32, #tpu.memory_space<vmem>>, vector<2x1xf32>,
    } else {
    }
    return
  }
  func.func @transform_0(%arg0: i32, %arg1: i32) -> (i32, i32) {
    %c0_i32 = arith.constant 0 : i32
    return %arg0, %arg1 : i32, i32
  }
  func.func @transform_1(%arg0: i32, %arg1: i32) -> (i32, i32) {
    %c0_i32 = arith.constant 0 : i32
    return %arg0, %arg1 : i32, i32
  }
  func.func @transform_2(%arg0: i32, %arg1: i32) -> (i32, i32) {
    %c0_i32 = arith.constant 0 : i32
    %c0_i32_0 = arith.constant 0 : i32
    return %arg0, %c0_i32 : i32, i32
  }
}

</mosaic_0001>

<bundles_post_ra>
// kernel: tpu_custom_call.1
= control target key start
LH: loop header
LB: loop body
LE: loop exit
PB: predicated region body
PF: predicated region fallthrough
CT: control target
= control target key end

     0   :  { %7 = vsyncpa [#allocation6], 0  ;;  %s235_s0 = inlined_call_operand.hbm [shape: f32[2,256], index: 0, kind: input, shape index: {}]   ;;  %s236_s1 = inlined_call_operand.hbm [shape: f32[2,256], index: 1, kind: input, shape index: {}]   ;;  %s237_s2 = inlined_call_operand.vmem [shape: f32[2,1], index: 2, kind: output, shape index: {}]  }
   0x1   :  { %8 = vsyncpa [#allocation8], 0  ;;  %s182_s9 = smov [#allocation5]   ;;  %s183_s11 = smov [#allocation7]  }
   0x2   :  { %s15_s10 = sshll.u32 %s182_s9, 4  ;;  %s25_s12 = sshll.u32 %s183_s11, 4  ;;  %s16_s10 = int_to_ptr.vmem [resolvable:$true] %s15_s10  ;;  %s26_s12 = int_to_ptr.vmem [resolvable:$true] %s25_s12 }
   0x3   :  { %s134_s15 = scalar_lea.hbm %s235_s0, 64 }
   0x4   :  { %p135_p0 = scmp.ne.s32.totalorder %s235_s0, %s134_s15  ;;  %p138_p1 = scmp.lt.u32.totalorder %s134_s15, %s235_s0 }
   0x6   :  { %p140_p2 = pnand %p138_p1, %p135_p0 }
   0x8   :  { %143 = shalt.err (!%p140_p2)
}
   0x9   :  { %s144_s20 = scalar_lea.vmem %s16_s10, 64  ;;  %p149_p4 = scmp.lt.s32.totalorder %s16_s10, %s16_s10 }
   0xa   :  { %p145_p3 = scmp.ne.s32.totalorder %s16_s10, %s144_s20  ;;  %p150_p5 = scmp.lt.s32.totalorder %s144_s20, %s144_s20 }
   0xc   :  { %p151_p6 = por %p150_p5, %p149_p4 }
   0xe   :  { %p152_p7 = pnand %p151_p6, %p145_p3 }
  0x10   :  { %155 = shalt.err (!%p152_p7)
}
  0x11   :  { %18 = dma.hbm_to_vmem [thread:$0]  %s235_s0, 64, %s16_s10, [#allocation6]  }
  0x12   :  { %s156_s25 = scalar_lea.hbm %s236_s1, 64 }
  0x13   :  { %p157_p8 = scmp.ne.s32.totalorder %s236_s1, %s156_s25  ;;  %p160_p9 = scmp.lt.u32.totalorder %s156_s25, %s236_s1 }
  0x15   :  { %p162_p10 = pnand %p160_p9, %p157_p8 }
  0x17   :  { %165 = shalt.err (!%p162_p10)
}
  0x18   :  { %s166_s30 = scalar_lea.vmem %s26_s12, 64  ;;  %p171_p12 = scmp.lt.s32.totalorder %s26_s12, %s26_s12 }
  0x19   :  { %p167_p11 = scmp.ne.s32.totalorder %s26_s12, %s166_s30  ;;  %p172_p13 = scmp.lt.s32.totalorder %s166_s30, %s166_s30 }
  0x1b   :  { %p173_p0 = por %p172_p13, %p171_p12 }
  0x1d   :  { %p174_p1 = pnand %p173_p0, %p167_p11 }
  0x1f   :  { %177 = shalt.err (!%p174_p1)
}
  0x20   :  { %28 = dma.hbm_to_vmem [thread:$0]  %s236_s1, 64, %s26_s12, [#allocation8]  }
  0x21   :  { %178 = dma.done.wait [#allocation6], 64  }
  0x22   :  { %179 = vsyncadd [#allocation6], 4294967232 }
  0x23   :  { %180 = dma.done.wait [#allocation8], 64  }
  0x24   :  { %181 = vsyncadd [#allocation8], 4294967232  ;;  %v51_v0 = vlaneseq  ;;  %vm39_vm0 = vcmask 1024   ;;  %v184_v1 = vmov 1983009808   ;;  %v185_v4 = vmov 0.0  }
  0x25   :  { %v49_v2 = vunpack.c.l.s4 %v184_v1  ;;  %42 = vst.msk [vmem:[#allocation4] sm:$0x3] %vm39_vm0, %v185_v4  ;;  %40 = vst.msk [vmem:[#allocation2] sm:$0x3] %vm39_vm0, %v185_v4  ;;  %v44_v7 = vld [vmem:[#allocation7] sm:$0xf] }
  0x26   :  { %v52_v3 = vshrl.u32 %v51_v0, 7  ;;  %41 = vst.msk [vmem:[#allocation3] sm:$0x3] %vm39_vm0, %v185_v4  ;;  %vm58_vm1 = vcmask 1041408   ;;  %v43_v8 = vld [vmem:[#allocation5] sm:$0xf] }
  0x27   :  { %v50_v5 = vunpack.c.0.s8 %v49_v2  ;;  %v46_v10 = vmul.f32 %v44_v7, %v43_v8 }
  0x29   :  { %v53_v6 = vsub.s32 %v50_v5, %v52_v3 }
  0x2b   :  { %v94_v9 = vrot.slane %v44_v7, %v53_v6  ;;  %v75_v11 = vrot.slane %v43_v8, %v53_v6  ;;  %v54_v14 = vrot.slane %v46_v10, %v53_v6 }
  0x2c   :  { %v86_v25 = vld [vmem:[#allocation4] sm:$0x3]  ;;  %v45_v27 = vld [vmem:[#allocation2] sm:$0x3] }
  0x2d   :  { %v95_v12 = vcombine.high %v94_v9, %v94_v9  ;;  %v98_v13 = vsel %vm58_vm1, %v94_v9, 0.0  ;;  %v76_v15 = vcombine.high %v75_v11, %v75_v11  ;;  %v55_v17 = vcombine.high %v54_v14, %v54_v14  ;;  %v67_v31 = vld [vmem:[#allocation3] sm:$0x3] }
  0x2e   :  { %v59_v18 = vsel %vm58_vm1, %v54_v14, 0.0  ;;  %v79_v21 = vsel %vm58_vm1, %v75_v11, 0.0 }
  0x2f   :  { %v99_v16 = vsel %vm58_vm1, %v95_v12, 0.0  ;;  %v60_v20 = vsel %vm58_vm1, %v55_v17, 0.0  ;;  %v80_v22 = vsel %vm58_vm1, %v76_v15, 0.0 }
  0x30   :  { %v100_v19 = vadd.f32 %v99_v16, %v98_v13  ;;  %v61_v23 = vadd.f32 %v60_v20, %v59_v18  ;;  %v81_v24 = vadd.f32 %v80_v22, %v79_v21 }
  0x32   :  { %101 = vadd.xlane.f32.xlu1 %v100_v19  ;;  %62 = vadd.xlane.f32.xlu0 %v61_v23 }
  0x36   :  { %82 = vadd.xlane.f32.xlu0 %v81_v24 }
  0xbf   :  { %v102_v26 = vpop.xlane.xlu1 %101  ;;  %v63_v29 = vpop.xlane.xlu0 %62 }
  0xc0   :  { %v103_v28 = vadd.f32 %v102_v26, %v86_v25  ;;  %v64_v30 = vadd.f32 %v63_v29, %v45_v27 }
  0xc2   :  { %104 = vst.msk [vmem:[#allocation4] sm:$0x3] %vm39_vm0, %v103_v28  ;;  %66 = vst.msk [vmem:[#allocation2] sm:$0x3] %vm39_vm0, %v64_v30 }
  0xc3   :  { %v83_v32 = vpop.xlane.xlu0 %82 }
  0xc4   :  { %v84_v33 = vadd.f32 %v83_v32, %v67_v31 }
  0xc6   :  { %85 = vst.msk [vmem:[#allocation3] sm:$0x3] %vm39_vm0, %v84_v33 }
  0xc9   :  { %v111_v34 = vld [vmem:[#allocation4] sm:$0x3]  ;;  %v108_v35 = vld [vmem:[#allocation2] sm:$0x3] }
  0xca   :  { %v112_v37 = vsub.f32 %v111_v34, %v108_v35 }
  0xcc   :  { %v115_v40 = vmul.f32 0.5, %v112_v37 }
  0xcd   :  { %v109_v36 = vld [vmem:[#allocation3] sm:$0x3] }
  0xce   :  { %v110_v38 = vsub.f32 %v109_v36, %v108_v35 }
  0xd0   :  { %v113_v39 = vmul.f32 0.5, %v110_v38 }
  0xd2   :  { %v114_v41 = vadd.f32 %v113_v39, %v108_v35 }
  0xd4   :  { %v116_v42 = vadd.f32 %v115_v40, %v114_v41 }
  0xd6   :  { %v117_v43 = vadd.f32 1e-08, %v116_v42 }
  0xd8   :  { %132 = vrcp.f32 %v117_v43 }
  0xe2   :  { %v133_v44 = vpop.eup %132 }
  0xe3   :  { %v119_v45 = vmul.f32 %v133_v44, %v108_v35 }
  0xe5   :  { %v120_v46 = vsub.f32 1.0, %v119_v45 }
  0xe7   :  { %121 = vst.msk [vmem:[%s237_s2] sm:$0x3] %vm39_vm0, %v120_v46 }
  0xe8   :  { %126 = vsyncpa [#allocation6], 1 }
  0xe9   :  { %127 = vsyncpa [#allocation8], 1 }

</bundles_post_ra>
